<compile_context>
chip_gen: v7x
topology: tpu7x:2x2x1
jax: 0.10.0
libtpu: 0.0.40
codegen_flags: <defaults>
</compile_context>

<pallas_src>
import functools

import jax
import jax.numpy as jnp
from jax.experimental import pallas as pl
from jax.experimental.pallas import tpu as pltpu

EPS = 1e-5
HIGHEST = jax.lax.Precision.HIGHEST


# ----------------------------------------------------------------------------- kernel
def _sepconv_kernel(*args, taps):
    """Fused depthwise3x3 -> pointwise1x1 (bf16 MXU, f32 acc) -> folded BN/bias -> ReLU.

    args = (x_refs..., wdw_ref, wpw_ref, shift_ref, out_ref)
      x_refs    : 1 ref (stride 1: row-tile of the zero-padded summed input,
                  (N, TH+2, W+2, C)) or 4 refs (stride 2: row-tiles of the even/odd
                  row/col phases of that padded input, (N, TH+1, Wo+1, C) each)
      wdw_ref   : (9, C)  f32  depthwise 3x3 weights, tap-major (kh*3+kw)
      wpw_ref   : (C, C)  bf16 pointwise weights (Cin, Cout) with BN scale folded in
      shift_ref : (1, C)  f32  folded depthwise/pointwise bias + BN shift
      out_ref   : (N, TH, Wo, C) f32
      taps      : static tuple of 9 entries (src_ref_idx, row_off, col_off), tap-major.
    """
    out_ref = args[-1]
    n_x = len(args) - 4
    x_refs = args[:n_x]
    wdw_ref, wpw_ref, shift_ref = args[n_x:-1]

    Nb, TH, Wo, C = out_ref.shape

    # depthwise 3x3: 9 shifted unit-stride windows, f32 VPU FMAs (hide under the MXU
    # matmul below).  First tap initializes the accumulator (no zeros+add pass).
    src0, dh0, dw0 = taps[0]
    acc = x_refs[src0][:, pl.ds(dh0, TH), pl.ds(dw0, Wo), :] * wdw_ref[0, :]
    for k, (src, dh, dw) in enumerate(taps[1:], start=1):
        tap = x_refs[src][:, pl.ds(dh, TH), pl.ds(dw, Wo), :]
        acc = acc + tap * wdw_ref[k, :]

    # pointwise 1x1 as ONE MXU matmul over every pixel in the block (M = N*TH*Wo thanks
    # to whole-batch blocking), bf16 operands / f32 accumulation, then folded bias + BN
    # shift + ReLU and one lane-dense full-block store.
    a = acc.reshape(Nb * TH * Wo, C).astype(jnp.bfloat16)
    res = jnp.dot(a, wpw_ref[...], preferred_element_type=jnp.float32)
    res = jnp.maximum(res + shift_ref[0, :], 0.0)
    out_ref[...] = res.reshape(Nb, TH, Wo, C)


def _row_tiles(x, tile_rows, step_rows, n_tiles):
    """(N, H, W, C) -> (N, n_tiles, tile_rows, W, C) overlapping row windows (halo)."""
    idx = jnp.arange(n_tiles)[:, None] * step_rows + jnp.arange(tile_rows)[None, :]
    return x[:, idx]


def sepconv_pallas(x_up, y, p, stride, th_rows=8):
    """x_up, y: (N, H, W, C) f32 of identical shape (x already upsampled to y's size).

    th_rows: output rows per grid step (keep a multiple of 8; 8-32 fits comfortably in
    v7x's 64 MiB VMEM at real PANet widths).  Falls back to a single tile when the
    output height is not divisible.
    """
    N, H, W, C = y.shape
    Ho = (H - 1) // stride + 1
    Wo = (W - 1) // stride + 1
    TH = th_rows if (Ho >= th_rows and Ho % th_rows == 0) else Ho
    n_tiles = Ho // TH

    # upsample-add + zero-pad + row-tiling (1-row halo duplication) fused in XLA.
    xp = jnp.pad(x_up + y, ((0, 0), (1, 1), (1, 1), (0, 0)))

    if stride == 1:
        xs = [_row_tiles(xp, TH + 2, TH, n_tiles)]
        taps = tuple((0, kh, kw) for kh in range(3) for kw in range(3))
    else:
        # stride-2: split the padded input into even/odd row/col phases so the kernel
        # computes the quarter-size output directly with unit-stride slices.
        phases = [xp[:, ph::2, pw::2, :] for ph in (0, 1) for pw in (0, 1)]
        xs = [_row_tiles(ph_, TH + 1, TH, n_tiles) for ph_ in phases]
        taps = tuple(((kh % 2) * 2 + (kw % 2), kh // 2, kw // 2)
                     for kh in range(3) for kw in range(3))

    in_specs = [pl.BlockSpec((N, None) + x.shape[2:], lambda t: (0, t, 0, 0, 0))
                for x in xs]
    in_specs += [
        pl.BlockSpec((9, C), lambda t: (0, 0)),
        pl.BlockSpec((C, C), lambda t: (0, 0)),
        pl.BlockSpec((1, C), lambda t: (0, 0)),
    ]

    return pl.pallas_call(
        functools.partial(_sepconv_kernel, taps=taps),
        out_shape=jax.ShapeDtypeStruct((N, Ho, Wo, C), jnp.float32),
        grid=(n_tiles,),
        in_specs=in_specs,
        out_specs=pl.BlockSpec((N, TH, Wo, C), lambda t: (0, t, 0, 0)),
        compiler_params=pltpu.CompilerParams(
            dimension_semantics=("parallel",),           # megacore / v7x 2-TC split
            vmem_limit_bytes=48 * 1024 * 1024),
    )(*xs, p["wdw"], p["wpw_folded"], p["shift"])


# ----------------------------------------------------------------------------- glue
def upsample_nearest_to(x, H, W):
    # matches F.interpolate(mode='nearest'): src_idx = floor(dst_idx * in/out)
    n, h, w, c = x.shape
    hi = (jnp.arange(H) * h) // H
    wi = (jnp.arange(W) * w) // W
    return x[:, hi][:, :, wi]


def fpem_forward(c2, c3, c4, c5, params, conv_fn):
    def up(x, y):
        return upsample_nearest_to(x, y.shape[1], y.shape[2]), y

    a, b = up(c5, c4); c4 = conv_fn(a, b, params["up_add1"], 1)
    a, b = up(c4, c3); c3 = conv_fn(a, b, params["up_add2"], 1)
    a, b = up(c3, c2); c2 = conv_fn(a, b, params["up_add3"], 1)
    a, b = up(c3, c2); c3 = conv_fn(a, b, params["down_add1"], 2)
    a, b = up(c4, c3); c4 = conv_fn(a, b, params["down_add2"], 2)
    a, b = up(c5, c4); c5 = conv_fn(a, b, params["down_add3"], 2)
    return c2, c3, c4, c5


# ----------------------------------------------------------------------------- params
def init_sepconv_params(key, C):
    k = jax.random.split(key, 8)
    wdw = jax.random.normal(k[0], (3, 3, C), jnp.float32) * 0.2      # depthwise (kh,kw,c)
    bdw = jax.random.normal(k[1], (C,), jnp.float32) * 0.1
    wpw = jax.random.normal(k[2], (C, C), jnp.float32) * 0.1         # (Cout, Cin) like torch
    bpw = jax.random.normal(k[3], (C,), jnp.float32) * 0.1
    gamma = 1.0 + 0.1 * jax.random.normal(k[4], (C,), jnp.float32)
    beta = 0.1 * jax.random.normal(k[5], (C,), jnp.float32)
    mean = 0.1 * jax.random.normal(k[6], (C,), jnp.float32)
    var = jnp.abs(jax.random.normal(k[7], (C,), jnp.float32)) + 0.5

    wmat = wpw.T                                                     # (Cin, Cout)
    scale = gamma / jnp.sqrt(var + EPS)                              # eval-mode BN scale
    wpw_folded = (wmat * scale[None, :]).astype(jnp.bfloat16)        # bf16 MXU operand
    shift = (jnp.dot(bdw, wmat, precision=HIGHEST) + bpw - mean) * scale + beta
    return dict(
        wdw=wdw.reshape(9, C), wpw_folded=wpw_folded, shift=shift.reshape(1, C),
        raw=dict(wdw=wdw, bdw=bdw, wpw=wpw, bpw=bpw,
                 gamma=gamma, beta=beta, mean=mean, var=var),
    )


# ----------------------------------------------------------------------------- references
def _sepconv_ref(xsum, raw, stride):
    C = xsum.shape[-1]
    dw = jax.lax.conv_general_dilated(
        xsum, raw["wdw"].reshape(3, 3, 1, C),
        window_strides=(stride, stride), padding=((1, 1), (1, 1)),
        dimension_numbers=("NHWC", "HWIO", "NHWC"), feature_group_count=C,
        precision=HIGHEST)
    dw = dw + raw["bdw"]
    pw = jnp.einsum("nhwc,oc->nhwo", dw, raw["wpw"], precision=HIGHEST) + raw["bpw"]
    bn = (pw - raw["mean"]) / jnp.sqrt(raw["var"] + EPS) * raw["gamma"] + raw["beta"]
    return jnp.maximum(bn, 0.0)


def sepconv_ref(x_up, y, p, stride):
    """Exact f32 PyTorch eval-mode semantics (no bf16 anywhere)."""
    return _sepconv_ref(x_up + y, p["raw"], stride)


def sepconv_matched_ref(x_up, y, p, stride):
    """Pure-XLA reference using the kernel's folded params and bf16 matmul policy.

    Tracks the Pallas kernel very closely, so it validates the tiling / halo / phase /
    tap mechanics to tight tolerance independently of the bf16 precision policy.
    """
    C = y.shape[-1]
    dw = jax.lax.conv_general_dilated(
        x_up + y, p["wdw"].reshape(3, 3, 1, C),
        window_strides=(stride, stride), padding=((1, 1), (1, 1)),
        dimension_numbers=("NHWC", "HWIO", "NHWC"), feature_group_count=C,
        precision=HIGHEST)
    res = jnp.dot(dw.astype(jnp.bfloat16).reshape(-1, C), p["wpw_folded"],
                  preferred_element_type=jnp.float32)
    res = jnp.maximum(res + p["shift"][0], 0.0)
    return res.reshape(dw.shape)


# ----------------------------------------------------------------------------- main
if __name__ == "__main__":
    key = jax.random.PRNGKey(0)
    k_in, k_par = jax.random.split(key)

    N, C = 2, 128                       # C=128: lane-dense (real FPEM channel width)
    ki = jax.random.split(k_in, 4)
    c2 = jax.random.normal(ki[0], (N, 16, 16, C), jnp.float32)   # NHWC
    c3 = jax.random.normal(ki[1], (N, 8, 8, C), jnp.float32)
    c4 = jax.random.normal(ki[2], (N, 4, 4, C), jnp.float32)
    c5 = jax.random.normal(ki[3], (N, 2, 2, C), jnp.float32)

    names = ["up_add1", "up_add2", "up_add3", "down_add1", "down_add2", "down_add3"]
    kp = jax.random.split(k_par, len(names))
    params = {name: init_sepconv_params(kk, C) for name, kk in zip(names, kp)}

    outs = jax.block_until_ready(fpem_forward(c2, c3, c4, c5, params, sepconv_pallas))

    refs_match = fpem_forward(c2, c3, c4, c5, params, sepconv_matched_ref)
    refs_exact = fpem_forward(c2, c3, c4, c5, params, sepconv_ref)

    for o, rm, rx in zip(outs, refs_match, refs_exact):
        assert o.shape == rm.shape == rx.shape, (o.shape, rm.shape, rx.shape)
        # Tight check vs the precision-matched XLA reference (same folded params, same
        # bf16 matmul operands): catches any tiling / halo / tap / stride bug.
        assert jnp.allclose(o, rm, rtol=1e-2, atol=1e-2), float(jnp.max(jnp.abs(o - rm)))
        # Loose check vs the exact f32 PyTorch-semantics reference: bounds the total
        # error introduced by the bf16 MXU-operand policy across the 6 chained stages.
        rel = float(jnp.max(jnp.abs(o - rx)) / (jnp.max(jnp.abs(rx)) + 1e-6))
        assert rel < 5e-2, rel

    print("KERNEL_OK")
</pallas_src>

<mosaic_0001>
module attributes {stable_mosaic.version = 11 : i64} {
  func.func @_sepconv_kernel(%arg0: i32, %arg1: memref<2x1x6x6x128xf32, #tpu.memory_space<vmem>>, %arg2: memref<9x128xf32, #tpu.memory_space<vmem>>, %arg3: memref<128x128xbf16, #tpu.memory_space<vmem>>, %arg4: memref<1x128xf32, #tpu.memory_space<vmem>>, %arg5: memref<2x4x4x128xf32, #tpu.memory_space<vmem>>) attributes {dimension_semantics = [#tpu.dimension_semantics<parallel>], iteration_bounds = array<i64: 1>, scalar_prefetch = 0 : i64, scratch_operands = 0 : i64, tpu.core_type = #tpu.core_type<tc>, window_params = [{transform_indices = @transform_0, window_bounds = array<i64: 2, 1, 6, 6, 128>}, {pipeline_mode = #tpu.pipeline_mode<synchronous>, transform_indices = @transform_1, window_bounds = array<i64: 9, 128>}, {pipeline_mode = #tpu.pipeline_mode<synchronous>, transform_indices = @transform_2, window_bounds = array<i64: 128, 128>}, {pipeline_mode = #tpu.pipeline_mode<synchronous>, transform_indices = @transform_3, window_bounds = array<i64: 1, 128>}, {transform_indices = @transform_4, window_bounds = array<i64: 2, 4, 4, 128>}]} {
    %c0 = arith.constant 0 : index
    %c0_0 = arith.constant 0 : index
    %c0_1 = arith.constant 0 : index
    %c0_2 = arith.constant 0 : index
    %c0_3 = arith.constant 0 : index
    %0 = vector.load %arg1[%c0, %c0_0, %c0_1, %c0_2, %c0_3] : memref<2x1x6x6x128xf32, #tpu.memory_space<vmem>>, vector<2x1x4x4x128xf32>
    %1 = vector.shape_cast %0 : vector<2x1x4x4x128xf32> to vector<2x4x4x128xf32>
    %c0_4 = arith.constant 0 : index
    %c0_5 = arith.constant 0 : index
    %2 = vector.load %arg2[%c0_4, %c0_5] : memref<9x128xf32, #tpu.memory_space<vmem>>, vector<1x128xf32>
    %3 = vector.shape_cast %2 : vector<1x128xf32> to vector<128xf32>
    %4 = vector.shape_cast %3 : vector<128xf32> to vector<1x1x1x128xf32>
    %5 = vector.broadcast %4 : vector<1x1x1x128xf32> to vector<2x4x4x128xf32>
    %6 = arith.mulf %1, %5 : vector<2x4x4x128xf32>
    %c0_6 = arith.constant 0 : index
    %c0_7 = arith.constant 0 : index
    %c0_8 = arith.constant 0 : index
    %c1 = arith.constant 1 : index
    %c0_9 = arith.constant 0 : index
    %7 = vector.load %arg1[%c0_6, %c0_7, %c0_8, %c1, %c0_9] : memref<2x1x6x6x128xf32, #tpu.memory_space<vmem>>, vector<2x1x4x4x128xf32>
    %8 = vector.shape_cast %7 : vector<2x1x4x4x128xf32> to vector<2x4x4x128xf32>
    %c1_10 = arith.constant 1 : index
    %c0_11 = arith.constant 0 : index
    %9 = vector.load %arg2[%c1_10, %c0_11] : memref<9x128xf32, #tpu.memory_space<vmem>>, vector<1x128xf32>
    %10 = vector.shape_cast %9 : vector<1x128xf32> to vector<128xf32>
    %11 = vector.shape_cast %10 : vector<128xf32> to vector<1x1x1x128xf32>
    %12 = vector.broadcast %11 : vector<1x1x1x128xf32> to vector<2x4x4x128xf32>
    %13 = arith.mulf %8, %12 : vector<2x4x4x128xf32>
    %14 = arith.addf %6, %13 : vector<2x4x4x128xf32>
    %c0_12 = arith.constant 0 : index
    %c0_13 = arith.constant 0 : index
    %c0_14 = arith.constant 0 : index
    %c2 = arith.constant 2 : index
    %c0_15 = arith.constant 0 : index
    %15 = vector.load %arg1[%c0_12, %c0_13, %c0_14, %c2, %c0_15] : memref<2x1x6x6x128xf32, #tpu.memory_space<vmem>>, vector<2x1x4x4x128xf32>
    %16 = vector.shape_cast %15 : vector<2x1x4x4x128xf32> to vector<2x4x4x128xf32>
    %c2_16 = arith.constant 2 : index
    %c0_17 = arith.constant 0 : index
    %17 = vector.load %arg2[%c2_16, %c0_17] : memref<9x128xf32, #tpu.memory_space<vmem>>, vector<1x128xf32>
    %18 = vector.shape_cast %17 : vector<1x128xf32> to vector<128xf32>
    %19 = vector.shape_cast %18 : vector<128xf32> to vector<1x1x1x128xf32>
    %20 = vector.broadcast %19 : vector<1x1x1x128xf32> to vector<2x4x4x128xf32>
    %21 = arith.mulf %16, %20 : vector<2x4x4x128xf32>
    %22 = arith.addf %14, %21 : vector<2x4x4x128xf32>
    %c0_18 = arith.constant 0 : index
    %c0_19 = arith.constant 0 : index
    %c1_20 = arith.constant 1 : index
    %c0_21 = arith.constant 0 : index
    %c0_22 = arith.constant 0 : index
    %23 = vector.load %arg1[%c0_18, %c0_19, %c1_20, %c0_21, %c0_22] : memref<2x1x6x6x128xf32, #tpu.memory_space<vmem>>, vector<2x1x4x4x128xf32>
    %24 = vector.shape_cast %23 : vector<2x1x4x4x128xf32> to vector<2x4x4x128xf32>
    %c3 = arith.constant 3 : index
    %c0_23 = arith.constant 0 : index
    %25 = vector.load %arg2[%c3, %c0_23] : memref<9x128xf32, #tpu.memory_space<vmem>>, vector<1x128xf32>
    %26 = vector.shape_cast %25 : vector<1x128xf32> to vector<128xf32>
    %27 = vector.shape_cast %26 : vector<128xf32> to vector<1x1x1x128xf32>
    %28 = vector.broadcast %27 : vector<1x1x1x128xf32> to vector<2x4x4x128xf32>
    %29 = arith.mulf %24, %28 : vector<2x4x4x128xf32>
    %30 = arith.addf %22, %29 : vector<2x4x4x128xf32>
    %c0_24 = arith.constant 0 : index
    %c0_25 = arith.constant 0 : index
    %c1_26 = arith.constant 1 : index
    %c1_27 = arith.constant 1 : index
    %c0_28 = arith.constant 0 : index
    %31 = vector.load %arg1[%c0_24, %c0_25, %c1_26, %c1_27, %c0_28] : memref<2x1x6x6x128xf32, #tpu.memory_space<vmem>>, vector<2x1x4x4x128xf32>
    %32 = vector.shape_cast %31 : vector<2x1x4x4x128xf32> to vector<2x4x4x128xf32>
    %c4 = arith.constant 4 : index
    %c0_29 = arith.constant 0 : index
    %33 = vector.load %arg2[%c4, %c0_29] : memref<9x128xf32, #tpu.memory_space<vmem>>, vector<1x128xf32>
    %34 = vector.shape_cast %33 : vector<1x128xf32> to vector<128xf32>
    %35 = vector.shape_cast %34 : vector<128xf32> to vector<1x1x1x128xf32>
    %36 = vector.broadcast %35 : vector<1x1x1x128xf32> to vector<2x4x4x128xf32>
    %37 = arith.mulf %32, %36 : vector<2x4x4x128xf32>
    %38 = arith.addf %30, %37 : vector<2x4x4x128xf32>
    %c0_30 = arith.constant 0 : index
    %c0_31 = arith.constant 0 : index
    %c1_32 = arith.constant 1 : index
    %c2_33 = arith.constant 2 : index
    %c0_34 = arith.constant 0 : index
    %39 = vector.load %arg1[%c0_30, %c0_31, %c1_32, %c2_33, %c0_34] : memref<2x1x6x6x128xf32, #tpu.memory_space<vmem>>, vector<2x1x4x4x128xf32>
    %40 = vector.shape_cast %39 : vector<2x1x4x4x128xf32> to vector<2x4x4x128xf32>
    %c5 = arith.constant 5 : index
    %c0_35 = arith.constant 0 : index
    %41 = vector.load %arg2[%c5, %c0_35] : memref<9x128xf32, #tpu.memory_space<vmem>>, vector<1x128xf32>
    %42 = vector.shape_cast %41 : vector<1x128xf32> to vector<128xf32>
    %43 = vector.shape_cast %42 : vector<128xf32> to vector<1x1x1x128xf32>
    %44 = vector.broadcast %43 : vector<1x1x1x128xf32> to vector<2x4x4x128xf32>
    %45 = arith.mulf %40, %44 : vector<2x4x4x128xf32>
    %46 = arith.addf %38, %45 : vector<2x4x4x128xf32>
    %c0_36 = arith.constant 0 : index
    %c0_37 = arith.constant 0 : index
    %c2_38 = arith.constant 2 : index
    %c0_39 = arith.constant 0 : index
    %c0_40 = arith.constant 0 : index
    %47 = vector.load %arg1[%c0_36, %c0_37, %c2_38, %c0_39, %c0_40] : memref<2x1x6x6x128xf32, #tpu.memory_space<vmem>>, vector<2x1x4x4x128xf32>
    %48 = vector.shape_cast %47 : vector<2x1x4x4x128xf32> to vector<2x4x4x128xf32>
    %c6 = arith.constant 6 : index
    %c0_41 = arith.constant 0 : index
    %49 = vector.load %arg2[%c6, %c0_41] : memref<9x128xf32, #tpu.memory_space<vmem>>, vector<1x128xf32>
    %50 = vector.shape_cast %49 : vector<1x128xf32> to vector<128xf32>
    %51 = vector.shape_cast %50 : vector<128xf32> to vector<1x1x1x128xf32>
    %52 = vector.broadcast %51 : vector<1x1x1x128xf32> to vector<2x4x4x128xf32>
    %53 = arith.mulf %48, %52 : vector<2x4x4x128xf32>
    %54 = arith.addf %46, %53 : vector<2x4x4x128xf32>
    %c0_42 = arith.constant 0 : index
    %c0_43 = arith.constant 0 : index
    %c2_44 = arith.constant 2 : index
    %c1_45 = arith.constant 1 : index
    %c0_46 = arith.constant 0 : index
    %55 = vector.load %arg1[%c0_42, %c0_43, %c2_44, %c1_45, %c0_46] : memref<2x1x6x6x128xf32, #tpu.memory_space<vmem>>, vector<2x1x4x4x128xf32>
    %56 = vector.shape_cast %55 : vector<2x1x4x4x128xf32> to vector<2x4x4x128xf32>
    %c7 = arith.constant 7 : index
    %c0_47 = arith.constant 0 : index
    %57 = vector.load %arg2[%c7, %c0_47] : memref<9x128xf32, #tpu.memory_space<vmem>>, vector<1x128xf32>
    %58 = vector.shape_cast %57 : vector<1x128xf32> to vector<128xf32>
    %59 = vector.shape_cast %58 : vector<128xf32> to vector<1x1x1x128xf32>
    %60 = vector.broadcast %59 : vector<1x1x1x128xf32> to vector<2x4x4x128xf32>
    %61 = arith.mulf %56, %60 : vector<2x4x4x128xf32>
    %62 = arith.addf %54, %61 : vector<2x4x4x128xf32>
    %c0_48 = arith.constant 0 : index
    %c0_49 = arith.constant 0 : index
    %c2_50 = arith.constant 2 : index
    %c2_51 = arith.constant 2 : index
    %c0_52 = arith.constant 0 : index
    %63 = vector.load %arg1[%c0_48, %c0_49, %c2_50, %c2_51, %c0_52] : memref<2x1x6x6x128xf32, #tpu.memory_space<vmem>>, vector<2x1x4x4x128xf32>
    %64 = vector.shape_cast %63 : vector<2x1x4x4x128xf32> to vector<2x4x4x128xf32>
    %c8 = arith.constant 8 : index
    %c0_53 = arith.constant 0 : index
    %65 = vector.load %arg2[%c8, %c0_53] : memref<9x128xf32, #tpu.memory_space<vmem>>, vector<1x128xf32>
    %66 = vector.shape_cast %65 : vector<1x128xf32> to vector<128xf32>
    %67 = vector.shape_cast %66 : vector<128xf32> to vector<1x1x1x128xf32>
    %68 = vector.broadcast %67 : vector<1x1x1x128xf32> to vector<2x4x4x128xf32>
    %69 = arith.mulf %64, %68 : vector<2x4x4x128xf32>
    %70 = arith.addf %62, %69 : vector<2x4x4x128xf32>
    %71 = vector.shape_cast %70 : vector<2x4x4x128xf32> to vector<32x128xf32>
    %72 = arith.truncf %71 : vector<32x128xf32> to vector<32x128xbf16>
    %c0_54 = arith.constant 0 : index
    %c0_55 = arith.constant 0 : index
    %73 = vector.load %arg3[%c0_54, %c0_55] : memref<128x128xbf16, #tpu.memory_space<vmem>>, vector<128x128xbf16>
    %cst = arith.constant dense<0.000000e+00> : vector<32x128xf32>
    %74 = tpu.matmul %72, %73, %cst {dimension_numbers = #tpu.dot_dimension_numbers<[1], [0], [0], [1], [0, 0, 1, 1], [], []>} : vector<32x128xbf16>, vector<128x128xbf16>, vector<32x128xf32> -> vector<32x128xf32>
    %c0_56 = arith.constant 0 : index
    %c0_57 = arith.constant 0 : index
    %75 = vector.load %arg4[%c0_56, %c0_57] : memref<1x128xf32, #tpu.memory_space<vmem>>, vector<1x128xf32>
    %76 = vector.shape_cast %75 : vector<1x128xf32> to vector<128xf32>
    %77 = vector.shape_cast %76 : vector<128xf32> to vector<1x128xf32>
    %78 = vector.broadcast %77 : vector<1x128xf32> to vector<32x128xf32>
    %79 = arith.addf %74, %78 : vector<32x128xf32>
    %cst_58 = arith.constant 0.000000e+00 : f32
    %80 = vector.broadcast %cst_58 : f32 to vector<32x128xf32>
    %81 = arith.maximumf %79, %80 : vector<32x128xf32>
    %82 = vector.shape_cast %81 : vector<32x128xf32> to vector<2x4x4x128xf32>
    %c0_59 = arith.constant 0 : index
    %c0_60 = arith.constant 0 : index
    %c0_61 = arith.constant 0 : index
    %c0_62 = arith.constant 0 : index
    %83 = vector.load %arg5[%c0_59, %c0_60, %c0_61, %c0_62] : memref<2x4x4x128xf32, #tpu.memory_space<vmem>>, vector<2x4x4x128xf32>
    tpu.vector_store %arg5[%c0_59, %c0_60, %c0_61, %c0_62], %82 {strides = array<i32>} : memref<2x4x4x128xf32, #tpu.memory_space<vmem>>, vector<2x4x4x128xf32>,
    return
  }
  func.func @transform_0(%arg0: i32) -> (i32, i32, i32, i32, i32) {
    %c0_i32 = arith.constant 0 : i32
    %c0_i32_0 = arith.constant 0 : i32
    %c0_i32_1 = arith.constant 0 : i32
    %c0_i32_2 = arith.constant 0 : i32
    %c0_i32_3 = arith.constant 0 : i32
    return %c0_i32, %arg0, %c0_i32_0, %c0_i32_1, %c0_i32_2 : i32, i32, i32, i32, i32
  }
  func.func @transform_1(%arg0: i32) -> (i32, i32) {
    %c0_i32 = arith.constant 0 : i32
    %c0_i32_0 = arith.constant 0 : i32
    %c0_i32_1 = arith.constant 0 : i32
    return %c0_i32, %c0_i32_0 : i32, i32
  }
  func.func @transform_2(%arg0: i32) -> (i32, i32) {
    %c0_i32 = arith.constant 0 : i32
    %c0_i32_0 = arith.constant 0 : i32
    %c0_i32_1 = arith.constant 0 : i32
    return %c0_i32, %c0_i32_0 : i32, i32
  }
  func.func @transform_3(%arg0: i32) -> (i32, i32) {
    %c0_i32 = arith.constant 0 : i32
    %c0_i32_0 = arith.constant 0 : i32
    %c0_i32_1 = arith.constant 0 : i32
    return %c0_i32, %c0_i32_0 : i32, i32
  }
  func.func @transform_4(%arg0: i32) -> (i32, i32, i32, i32) {
    %c0_i32 = arith.constant 0 : i32
    %c0_i32_0 = arith.constant 0 : i32
    %c0_i32_1 = arith.constant 0 : i32
    %c0_i32_2 = arith.constant 0 : i32
    return %c0_i32, %arg0, %c0_i32_0, %c0_i32_1 : i32, i32, i32, i32
  }
}

</mosaic_0001>

<bundles_post_ra>
// kernel: tpu_custom_call.1
= control target key start
LH: loop header
LB: loop body
LE: loop exit
PB: predicated region body
PF: predicated region fallthrough
CT: control target
= control target key end

     0   :  { %s995_s0 = inlined_call_operand.vmem [shape: f32[2,1,6,6,128], index: 0, kind: input, shape index: {}]   ;;  %s996_s1 = inlined_call_operand.vmem [shape: f32[9,128], index: 1, kind: input, shape index: {}]   ;;  %s997_s2 = inlined_call_operand.vmem [shape: bf16[128,128], index: 2, kind: input, shape index: {}]   ;;  %s998_s3 = inlined_call_operand.vmem [shape: f32[1,128], index: 3, kind: input, shape index: {}]   ;;  %s999_s4 = inlined_call_operand.hbm [shape: f32[2,4,4,128], index: 4, kind: output, shape index: {}]  }
   0x1   :  { %v551_v0 = vld [vmem:[%s997_s2] sm:$0xff]   ;;  %v552_v1 = vld [vmem:[%s997_s2 + $0x8] sm:$0xff]   ;;  %v553_v2 = vld [vmem:[%s997_s2 + $0x10] sm:$0xff]  }
   0x2   :  { %528 = vmatprep.subr.bf16.mxu0 %v551_v0  ;;  %v554_v3 = vld [vmem:[%s997_s2 + $0x18] sm:$0xff]   ;;  %v19_v4 = vld [vmem:[%s995_s0] sm:$0xf]  ;;  %v20_v5 = vld [vmem:[%s995_s0 + $0x8] sm:$0xf] }
   0x3   :  { %529 = vmatpush3.bf16.msra.mxu0 %v551_v0  ;;  %v21_v6 = vld [vmem:[%s995_s0 + $0x10] sm:$0xf]  ;;  %v22_v7 = vld [vmem:[%s995_s0 + $0x18] sm:$0xf]  ;;  %v638_v8 = vld [vmem:[%s996_s1] ss:$0 sm:$0xff] }
   0x4   :  { %530 = vmatprep.subr.bf16.mxu0 %v552_v1  ;;  %v40_v9 = vld [vmem:[%s995_s0 + $0x1] sm:$0xf]  ;;  %v32_v11 = vmul.f32 %v638_v8, %v19_v4  ;;  %v33_v12 = vmul.f32 %v638_v8, %v20_v5  ;;  %v34_v13 = vmul.f32 %v638_v8, %v21_v6  ;;  %v35_v14 = vmul.f32 %v638_v8, %v22_v7  ;;  %v41_v15 = vld [vmem:[%s995_s0 + $0x9] sm:$0xf]  ;;  %v42_v16 = vld [vmem:[%s995_s0 + $0x11] sm:$0xf] }
   0x5   :  { %v646_v10 = vld [vmem:[%s997_s2 + $0x20] sm:$0xff]   ;;  %v43_v17 = vld [vmem:[%s995_s0 + $0x19] sm:$0xf]  ;;  %v70_v20 = vld [vmem:[%s995_s0 + $0xa] sm:$0xf] }
   0x6   :  { %v664_v18 = vld [vmem:[%s996_s1 + $0x1] ss:$0 sm:$0xff]  ;;  %v69_v19 = vld [vmem:[%s995_s0 + $0x2] sm:$0xf]  ;;  %v71_v25 = vld [vmem:[%s995_s0 + $0x12] sm:$0xf] }
   0x7   :  { %531 = vmatpush3.bf16.msra.mxu0 %v552_v1  ;;  %v53_v21 = vmul.f32 %v664_v18, %v40_v9  ;;  %v54_v22 = vmul.f32 %v664_v18, %v41_v15  ;;  %v55_v23 = vmul.f32 %v664_v18, %v42_v16  ;;  %v56_v24 = vmul.f32 %v664_v18, %v43_v17  ;;  %v72_v26 = vld [vmem:[%s995_s0 + $0x1a] sm:$0xf]  ;;  %v685_v27 = vld [vmem:[%s996_s1 + $0x2] ss:$0 sm:$0xff]  ;;  %v455_v32 = vld [vmem:[%s995_s0 + $0x8] sm:$0xf] }
   0x8   :  { %532 = vmatprep.subr.bf16.mxu0 %v553_v2  ;;  %v82_v28 = vmul.f32 %v685_v27, %v69_v19  ;;  %v83_v29 = vmul.f32 %v685_v27, %v70_v20  ;;  %v84_v30 = vmul.f32 %v685_v27, %v71_v25  ;;  %v85_v31 = vmul.f32 %v685_v27, %v72_v26  ;;  %v456_v33 = vld [vmem:[%s995_s0 + $0x10] sm:$0xf]  ;;  %v457_v34 = vld [vmem:[%s995_s0 + $0x18] sm:$0xf]  ;;  %v703_v35 = vld [vmem:[%s997_s2 + $0x28] sm:$0xff]  }
   0x9   :  { %v61_v36 = vadd.f32 %v53_v21, %v32_v11  ;;  %v62_v37 = vadd.f32 %v54_v22, %v33_v12  ;;  %v63_v38 = vadd.f32 %v55_v23, %v34_v13  ;;  %v64_v39 = vadd.f32 %v56_v24, %v35_v14  ;;  %v458_v40 = vld [vmem:[%s995_s0 + $0x20] sm:$0xf]  ;;  %v464_v42 = vld [vmem:[%s995_s0 + $0x9] sm:$0xf]  ;;  %v465_v47 = vld [vmem:[%s995_s0 + $0x11] sm:$0xf] }
   0xa   :  { %v711_v41 = vld [vmem:[%s996_s1 + $0x3] ss:$0 sm:$0xff]  ;;  %v466_v48 = vld [vmem:[%s995_s0 + $0x19] sm:$0xf]  ;;  %v733_v54 = vld [vmem:[%s996_s1 + $0x4] ss:$0 sm:$0xff] }
   0xb   :  { %533 = vmatpush3.bf16.msra.mxu0 %v553_v2  ;;  %v112_v43 = vmul.f32 %v711_v41, %v455_v32  ;;  %v113_v44 = vmul.f32 %v711_v41, %v456_v33  ;;  %v114_v45 = vmul.f32 %v711_v41, %v457_v34  ;;  %v115_v46 = vmul.f32 %v711_v41, %v458_v40  ;;  %v467_v49 = vld [vmem:[%s995_s0 + $0x21] sm:$0xf]  ;;  %v473_v55 = vld [vmem:[%s995_s0 + $0xa] sm:$0xf]  ;;  %v474_v56 = vld [vmem:[%s995_s0 + $0x12] sm:$0xf] }
   0xc   :  { %534 = vmatprep.subr.bf16.mxu0 %v554_v3  ;;  %v90_v50 = vadd.f32 %v82_v28, %v61_v36  ;;  %v91_v51 = vadd.f32 %v83_v29, %v62_v37  ;;  %v92_v52 = vadd.f32 %v84_v30, %v63_v38  ;;  %v93_v53 = vadd.f32 %v85_v31, %v64_v39  ;;  %v475_v61 = vld [vmem:[%s995_s0 + $0x1a] sm:$0xf]  ;;  %v476_v62 = vld [vmem:[%s995_s0 + $0x22] sm:$0xf]  ;;  %v759_v0 = vld [vmem:[%s997_s2 + $0x30] sm:$0xff]  }
   0xd   :  { %v141_v57 = vmul.f32 %v733_v54, %v464_v42  ;;  %v142_v58 = vmul.f32 %v733_v54, %v465_v47  ;;  %v143_v59 = vmul.f32 %v733_v54, %v466_v48  ;;  %v144_v60 = vmul.f32 %v733_v54, %v467_v49  ;;  %v754_v63 = vld [vmem:[%s996_s1 + $0x5] ss:$0 sm:$0xff]  ;;  %v482_v5 = vld [vmem:[%s995_s0 + $0x10] sm:$0xf]  ;;  %v483_v6 = vld [vmem:[%s995_s0 + $0x18] sm:$0xf] }
   0xe   :  { %v120_v1 = vadd.f32 %v112_v43, %v90_v50  ;;  %v121_v2 = vadd.f32 %v113_v44, %v91_v51  ;;  %v123_v4 = vadd.f32 %v115_v46, %v93_v53  ;;  %v484_v7 = vld [vmem:[%s995_s0 + $0x20] sm:$0xf]  ;;  %v170_v9 = vmul.f32 %v754_v63, %v473_v55  ;;  %v485_v14 = vld [vmem:[%s995_s0 + $0x28] sm:$0xf]  ;;  %v781_v15 = vld [vmem:[%s996_s1 + $0x6] ss:$0 sm:$0xff] }
   0xf   :  { %535 = vmatpush3.bf16.msra.mxu0 %v554_v3  ;;  %v122_v3 = vadd.f32 %v114_v45, %v92_v52  ;;  %v171_v11 = vmul.f32 %v754_v63, %v474_v56  ;;  %v172_v12 = vmul.f32 %v754_v63, %v475_v61  ;;  %v173_v13 = vmul.f32 %v754_v63, %v476_v62  ;;  %v492_v21 = vld [vmem:[%s995_s0 + $0x19] sm:$0xf]  ;;  %v493_v22 = vld [vmem:[%s995_s0 + $0x21] sm:$0xf]  ;;  %v494_v23 = vld [vmem:[%s995_s0 + $0x29] sm:$0xf] }
  0x10   :  { %536 = vmatprep.subr.bf16.mxu0 %v646_v10  ;;  %v149_v16 = vadd.f32 %v141_v57, %v120_v1  ;;  %v150_v17 = vadd.f32 %v142_v58, %v121_v2  ;;  %v152_v20 = vadd.f32 %v144_v60, %v123_v4  ;;  %v200_v24 = vmul.f32 %v781_v15, %v482_v5  ;;  %v803_v29 = vld [vmem:[%s996_s1 + $0x7] ss:$0 sm:$0xff]  ;;  %v500_v30 = vld [vmem:[%s995_s0 + $0x12] sm:$0xf]  ;;  %v501_v31 = vld [vmem:[%s995_s0 + $0x1a] sm:$0xf] }
  0x11   :  { %v151_v19 = vadd.f32 %v143_v59, %v122_v3  ;;  %v201_v25 = vmul.f32 %v781_v15, %v483_v6  ;;  %v202_v26 = vmul.f32 %v781_v15, %v484_v7  ;;  %v203_v28 = vmul.f32 %v781_v15, %v485_v14  ;;  %v502_v37 = vld [vmem:[%s995_s0 + $0x22] sm:$0xf]  ;;  %v503_v38 = vld [vmem:[%s995_s0 + $0x2a] sm:$0xf]  ;;  %v820_v39 = vld [vmem:[%s996_s1 + $0x8] ss:$0 sm:$0xff] }
  0x12   :  { %v178_v32 = vadd.f32 %v170_v9, %v149_v16  ;;  %v179_v33 = vadd.f32 %v171_v11, %v150_v17  ;;  %v181_v36 = vadd.f32 %v173_v13, %v152_v20  ;;  %v558_v40 = vld [vmem:[%s997_s2 + $0x38] sm:$0xff]   ;;  %v230_v43 = vmul.f32 %v803_v29, %v492_v21  ;;  %v23_v46 = vld [vmem:[%s995_s0 + $0x30] sm:$0xf]  ;;  %v25_v51 = vld [vmem:[%s995_s0 + $0x40] sm:$0xf] }
  0x13   :  { %537 = vmatpush3.bf16.msra.mxu0 %v646_v10  ;;  %v491_v10 = vld [vmem:[%s995_s0 + $0x11] sm:$0xf]  ;;  %v180_v34 = vadd.f32 %v172_v12, %v151_v19  ;;  %v231_v44 = vmul.f32 %v803_v29, %v493_v22  ;;  %v232_v45 = vmul.f32 %v803_v29, %v494_v23  ;;  %v24_v50 = vld [vmem:[%s995_s0 + $0x38] sm:$0xf]  ;;  %v26_v52 = vld [vmem:[%s995_s0 + $0x48] sm:$0xf]  ;;  %v258_v53 = vmul.f32 %v820_v39, %v500_v30 }
  0x14   :  { %538 = vmatprep.subr.bf16.mxu0 %v703_v35  ;;  %v229_v42 = vmul.f32 %v803_v29, %v491_v10  ;;  %v208_v47 = vadd.f32 %v200_v24, %v178_v32  ;;  %v211_v49 = vadd.f32 %v203_v28, %v181_v36  ;;  %v259_v55 = vmul.f32 %v820_v39, %v501_v31  ;;  %v44_v58 = vld [vmem:[%s995_s0 + $0x31] sm:$0xf]  ;;  %v45_v1 = vld [vmem:[%s995_s0 + $0x39] sm:$0xf]  ;;  %v46_v2 = vld [vmem:[%s995_s0 + $0x41] sm:$0xf] }
  0x15   :  { %v210_v48 = vadd.f32 %v202_v26, %v180_v34  ;;  %v260_v56 = vmul.f32 %v820_v39, %v502_v37  ;;  %v261_v57 = vmul.f32 %v820_v39, %v503_v38  ;;  %v47_v3 = vld [vmem:[%s995_s0 + $0x49] sm:$0xf]  ;;  %v36_v4 = vmul.f32 %v638_v8, %v23_v46  ;;  %v73_v9 = vld [vmem:[%s995_s0 + $0x32] sm:$0xf]  ;;  %v74_v11 = vld [vmem:[%s995_s0 + $0x3a] sm:$0xf] }
  0x16   :  { %v237_v59 = vadd.f32 %v229_v42, %v208_v47  ;;  %v240_v62 = vadd.f32 %v232_v45, %v211_v49  ;;  %v37_v5 = vmul.f32 %v638_v8, %v24_v50  ;;  %v38_v6 = vmul.f32 %v638_v8, %v25_v51  ;;  %v75_v19 = vld [vmem:[%s995_s0 + $0x42] sm:$0xf]  ;;  %v76_v20 = vld [vmem:[%s995_s0 + $0x4a] sm:$0xf]  ;;  %v459_v21 = vld [vmem:[%s995_s0 + $0x38] sm:$0xf] }
  0x17   :  { %539 = vmatpush3.bf16.msra.mxu0 %v703_v35  ;;  %v209_v35 = vadd.f32 %v201_v25, %v179_v33  ;;  %v239_v61 = vadd.f32 %v231_v44, %v210_v48  ;;  %v39_v7 = vmul.f32 %v638_v8, %v26_v52  ;;  %v57_v10 = vmul.f32 %v664_v18, %v44_v58  ;;  %v461_v26 = vld [vmem:[%s995_s0 + $0x48] sm:$0xf]  ;;  %v462_v33 = vld [vmem:[%s995_s0 + $0x50] sm:$0xf]  ;;  %v468_v34 = vld [vmem:[%s995_s0 + $0x39] sm:$0xf] }
  0x18   :  { %540 = vmatprep.subr.bf16.mxu0 %v759_v0  ;;  %v266_v12 = vadd.f32 %v258_v53, %v237_v59  ;;  %v269_v14 = vadd.f32 %v261_v57, %v240_v62  ;;  %v58_v16 = vmul.f32 %v664_v18, %v45_v1  ;;  %v59_v17 = vmul.f32 %v664_v18, %v46_v2  ;;  %v478_v52 = vld [vmem:[%s995_s0 + $0x42] sm:$0xf]  ;;  %v479_v53 = vld [vmem:[%s995_s0 + $0x4a] sm:$0xf] }
  0x19   :  { %v238_v60 = vadd.f32 %v230_v43, %v209_v35  ;;  %v60_v8 = vmul.f32 %v664_v18, %v47_v3  ;;  %v86_v24 = vmul.f32 %v685_v27, %v73_v9  ;;  %v87_v25 = vmul.f32 %v685_v27, %v74_v11  ;;  %v460_v18 = vld [vmem:[%s995_s0 + $0x40] sm:$0xf]  ;;  %v470_v43 = vld [vmem:[%s995_s0 + $0x49] sm:$0xf]  ;;  %v477_v35 = vld [vmem:[%s995_s0 + $0x3a] sm:$0xf] }
  0x1a   :  { %v65_v28 = vadd.f32 %v57_v10, %v36_v4  ;;  %v66_v30 = vadd.f32 %v58_v16, %v37_v5  ;;  %v67_v31 = vadd.f32 %v59_v17, %v38_v6  ;;  %v88_v37 = vmul.f32 %v685_v27, %v75_v19  ;;  %v486_v59 = vld [vmem:[%s995_s0 + $0x40] sm:$0xf] }
  0x1b   :  { %541 = vmatpush3.bf16.msra.mxu0 %v759_v0  ;;  %v267_v13 = vadd.f32 %v259_v55, %v238_v60  ;;  %v268_v0 = vadd.f32 %v260_v56, %v239_v61  ;;  %v68_v32 = vadd.f32 %v60_v8, %v39_v7  ;;  %v89_v38 = vmul.f32 %v685_v27, %v76_v20  ;;  %v471_v27 = vld [vmem:[%s995_s0 + $0x51] sm:$0xf] }
  0x1c   :  { %542 = vmatprep.subr.bf16.mxu0 %v558_v40  ;;  %v116_v42 = vmul.f32 %v711_v41, %v459_v21  ;;  %v94_v44 = vadd.f32 %v86_v24, %v65_v28  ;;  %v95_v45 = vadd.f32 %v87_v25, %v66_v30  ;;  %v117_v46 = vmul.f32 %v711_v41, %v460_v18 }
  0x1d   :  { %v282_v22 = vcombine.low %v266_v12, %v267_v13  ;;  %v283_v23 = vcombine.low %v268_v0, %v269_v14  ;;  %v118_v47 = vmul.f32 %v711_v41, %v461_v26  ;;  %v96_v48 = vadd.f32 %v88_v37, %v67_v31 }
  0x1e   :  { %v97_v49 = vadd.f32 %v89_v38, %v68_v32  ;;  %v119_v50 = vmul.f32 %v711_v41, %v462_v33  ;;  %v145_v51 = vmul.f32 %v733_v54, %v468_v34  ;;  %v124_v55 = vadd.f32 %v116_v42, %v94_v44  ;;  %v480_v41 = vld [vmem:[%s995_s0 + $0x52] sm:$0xf] }
  0x1f   :  { %543 = vmatpush3.bf16.msra.mxu0 %v558_v40  ;;  %v290_v36 = vpack.c.bf16 %v283_v23, %v282_v22  ;;  %v469_v40 = vld [vmem:[%s995_s0 + $0x41] sm:$0xf]  ;;  %v125_v56 = vadd.f32 %v117_v46, %v95_v45  ;;  %v147_v58 = vmul.f32 %v733_v54, %v470_v43 }
  0x20   :  { %v146_v57 = vmul.f32 %v733_v54, %v469_v40 }
  0x21   :  { %544 = vmatprep.mubr.bf16.mxu0 %v290_v36 }
  0x22   :  { %9 = vsyncpa [#allocation3], 0  ;;  %v126_v60 = vadd.f32 %v118_v47, %v96_v48  ;;  %v127_v61 = vadd.f32 %v119_v50, %v97_v49  ;;  %v148_v62 = vmul.f32 %v733_v54, %v471_v27  ;;  %v174_v1 = vmul.f32 %v754_v63, %v477_v35  ;;  %v487_v2 = vld [vmem:[%s995_s0 + $0x48] sm:$0xf]  ;;  %v488_v3 = vld [vmem:[%s995_s0 + $0x50] sm:$0xf] }
  0x23   :  { %v153_v4 = vadd.f32 %v145_v51, %v124_v55  ;;  %v154_v5 = vadd.f32 %v146_v57, %v125_v56  ;;  %v175_v6 = vmul.f32 %v754_v63, %v478_v52  ;;  %v176_v7 = vmul.f32 %v754_v63, %v479_v53  ;;  %v489_v54 = vld [vmem:[%s995_s0 + $0x58] sm:$0xf]  ;;  %v495_v9 = vld [vmem:[%s995_s0 + $0x41] sm:$0xf]  ;;  %v496_v14 = vld [vmem:[%s995_s0 + $0x49] sm:$0xf] }
  0x24   :  { %v155_v11 = vadd.f32 %v147_v58, %v126_v60  ;;  %v156_v12 = vadd.f32 %v148_v62, %v127_v61  ;;  %v177_v13 = vmul.f32 %v754_v63, %v480_v41  ;;  %v204_v0 = vmul.f32 %v781_v15, %v486_v59  ;;  %v497_v10 = vld [vmem:[%s995_s0 + $0x51] sm:$0xf]  ;;  %v498_v63 = vld [vmem:[%s995_s0 + $0x59] sm:$0xf]  ;;  %v504_v20 = vld [vmem:[%s995_s0 + $0x42] sm:$0xf] }
  0x25   :  { %v182_v16 = vadd.f32 %v174_v1, %v153_v4  ;;  %v183_v17 = vadd.f32 %v175_v6, %v154_v5  ;;  %v205_v8 = vmul.f32 %v781_v15, %v487_v2  ;;  %v206_v19 = vmul.f32 %v781_v15, %v488_v3  ;;  %v505_v25 = vld [vmem:[%s995_s0 + $0x4a] sm:$0xf]  ;;  %v506_v18 = vld [vmem:[%s995_s0 + $0x52] sm:$0xf]  ;;  %s583_s6 = smov [#allocation2]  }
  0x26   :  { %v184_v21 = vadd.f32 %v176_v7, %v155_v11  ;;  %v185_v22 = vadd.f32 %v177_v13, %v156_v12  ;;  %v207_v23 = vmul.f32 %v781_v15, %v489_v54  ;;  %v233_v24 = vmul.f32 %v803_v29, %v495_v9  ;;  %v507_v15 = vld [vmem:[%s995_s0 + $0x5a] sm:$0xf]  ;;  %s441_s7 = sshll.u32 %s583_s6, 4  ;;  %s442_s7 = int_to_ptr.vmem [resolvable:$true] %s441_s7 }
  0x27   :  { %v212_v26 = vadd.f32 %v204_v0, %v182_v16  ;;  %v213_v28 = vadd.f32 %v205_v8, %v183_v17  ;;  %v234_v30 = vmul.f32 %v803_v29, %v496_v14  ;;  %v235_v31 = vmul.f32 %v803_v29, %v497_v10  ;;  %p564_p1 = scmp.lt.s32.totalorder %s442_s7, %s442_s7 }
  0x28   :  { %v214_v32 = vadd.f32 %v206_v19, %v184_v21  ;;  %v215_v33 = vadd.f32 %v207_v23, %v185_v22  ;;  %v236_v34 = vmul.f32 %v803_v29, %v498_v63  ;;  %v262_v36 = vmul.f32 %v820_v39, %v504_v20  ;;  %v509_v29 = vld [vmem:[%s998_s3] ss:$0 sm:$0xff]  ;;  %s559_s3 = scalar_lea.vmem %s442_s7, 512 }
  0x29   :  { %v241_v37 = vadd.f32 %v233_v24, %v212_v26  ;;  %v242_v38 = vadd.f32 %v234_v30, %v213_v28  ;;  %v263_v42 = vmul.f32 %v820_v39, %v505_v25  ;;  %v264_v40 = vmul.f32 %v820_v39, %v506_v18  ;;  %p560_p0 = scmp.ne.s32.totalorder %s442_s7, %s559_s3  ;;  %p565_p2 = scmp.lt.s32.totalorder %s559_s3, %s559_s3 }
  0x2a   :  { %v243_v43 = vadd.f32 %v235_v31, %v214_v32  ;;  %v244_v44 = vadd.f32 %v236_v34, %v215_v33  ;;  %v265_v45 = vmul.f32 %v820_v39, %v507_v15 }
  0x2b   :  { %v270_v46 = vadd.f32 %v262_v36, %v241_v37  ;;  %v271_v47 = vadd.f32 %v263_v42, %v242_v38  ;;  %p566_p3 = por %p565_p2, %p564_p1 }
  0x2c   :  { %v272_v27 = vadd.f32 %v264_v40, %v243_v43  ;;  %v273_v35 = vadd.f32 %v265_v45, %v244_v44 }
  0x2d   :  { %v284_v48 = vcombine.low %v270_v46, %v271_v47  ;;  %p567_p4 = pnand %p566_p3, %p560_p0 }
  0x2e   :  { %v285_v49 = vcombine.low %v272_v27, %v273_v35 }
  0x30   :  { %v291_v50 = vpack.c.bf16 %v285_v49, %v284_v48 }
  0x32   :  { %545 = vmatmul.mubr.bf16.vlgmr.msra.gmra.mrb[0].mxu0 %v291_v50 }
 0x105   :  { %v546_v51 = vpop.f32.mrb[0].mxu0 }
 0x106   :  { %v406_v52 = vadd.f32 %v546_v51, %v509_v29  ;;  %v397_v53 = vpop.f32.mrb[1].mxu0 }
 0x107   :  { %v398_v55 = vadd.f32 %v509_v29, %v397_v53  ;;  %v547_v56 = vpop.f32.mrb[2].mxu0 }
 0x108   :  { %v414_v57 = vmax.f32 %v406_v52, 0.0  ;;  %v409_v58 = vadd.f32 %v547_v56, %v509_v29  ;;  %v400_v39 = vpop.f32.mrb[3].mxu0 }
 0x109   :  { %v412_v41 = vmax.f32 %v398_v55, 0.0  ;;  %v401_v59 = vadd.f32 %v509_v29, %v400_v39 }
 0x10a   :  { %v422_v60 = vcombine.high %v414_v57, %v414_v57  ;;  %432 = vst [vmem:[#allocation2 + $0x10] sm:$0xf] %v414_v57  ;;  %v415_v61 = vmax.f32 %v409_v58, 0.0 }
 0x10b   :  { %v420_v62 = vcombine.high %v412_v41, %v412_v41  ;;  %428 = vst [vmem:[#allocation2] sm:$0xf] %v412_v41  ;;  %v413_v1 = vmax.f32 %v401_v59, 0.0 }
 0x10c   :  { %433 = vst [vmem:[#allocation2 + $0x14] sm:$0xf] %v422_v60  ;;  %v423_v2 = vcombine.high %v415_v61, %v415_v61  ;;  %434 = vst [vmem:[#allocation2 + $0x18] sm:$0xf] %v415_v61 }
 0x10d   :  { %429 = vst [vmem:[#allocation2 + $0x4] sm:$0xf] %v420_v62  ;;  %v421_v3 = vcombine.high %v413_v1, %v413_v1  ;;  %430 = vst [vmem:[#allocation2 + $0x8] sm:$0xf] %v413_v1 }
 0x10e   :  { %435 = vst [vmem:[#allocation2 + $0x1c] sm:$0xf] %v423_v2 }
 0x10f   :  { %431 = vst [vmem:[#allocation2 + $0xc] sm:$0xf] %v421_v3 }
 0x110   :  { %570 = shalt.err (!%p567_p4)
}
 0x111   :  { %s571_s10 = scalar_lea.hbm %s999_s4, 512 }
 0x112   :  { %p572_p5 = scmp.ne.s32.totalorder %s999_s4, %s571_s10  ;;  %p575_p6 = scmp.lt.u32.totalorder %s571_s10, %s999_s4 }
 0x114   :  { %p577_p7 = pnand %p575_p6, %p572_p5 }
 0x116   :  { %580 = shalt.err (!%p577_p7)
}
 0x117   :  { %s584_s15 = smov 64   ;;  %s585_s16 = smov 4  }
 0x118   :  { %447 = dma.vmem_to_hbm [thread:$0]  %s442_s7, 512, %s999_s4, [#allocation3], %s584_s15, %s584_s15, %s585_s16  }
 0x119   :  { %581 = dma.done.wait [#allocation3], 512  }
 0x11a   :  { %582 = vsyncadd [#allocation3], 4294966784 }
 0x11b   :  { %451 = vsyncpa [#allocation3], 1 }

</bundles_post_ra>
